<compile_context>
chip_gen: v6e
topology: v6e:2x2x1
jax: 0.10.0
libtpu: 0.0.40
codegen_flags: <defaults>
</compile_context>

<pallas_src>
import jax
import jax.numpy as jnp
from jax import lax
from jax.experimental import pallas as pl
from jax.experimental.pallas import tpu as pltpu

LANE = 128                 # pad channel dims to multiples of the lane width
MM_DTYPE = jnp.bfloat16    # matmul operand dtype (accumulation is always f32)


def _round_up(v, m):
    return ((v + m - 1) // m) * m


def _node_align(n):
    # 128-aligned node dim -> dense lane layout for the adjacency and clean MXU K
    # tiles for the aggregation matmuls; 16-align only tiny graphs where the
    # quadratic adjacency padding would dominate.
    return 128 if n >= 64 else 16


def _pad2(a, rows, cols):
    r, c = a.shape
    return jnp.pad(a, ((0, rows - r), (0, cols - c)))


def _vmem_budget_bytes():
    # Generation-aware VMEM budget: ~85% of physical capacity
    # (~108 MiB on v5e/v6e's 128 MiB, ~54 MiB on v7x's 64 MiB).
    try:
        cap = pltpu.get_tpu_info().vmem_capacity_bytes
        return int(cap * 0.85)
    except Exception:
        return 48 * 1024 * 1024   # conservative fallback, safe on every generation


# ----------------------------- fused Pallas kernel -------------------------- #

def _make_fused_kernel(num_layers, cout_p):
    """Whole-network kernel: every RelConv layer + ReLU + final Linear, fused.

    Input refs, in order:
      x        (Np, Cin_p)        MM_DTYPE
      a        (Np, Np)           MM_DTYPE   raw edge counts a[dst, src] (exact ints)
      invd1    (Np, 1)            f32        1/deg, flow source->target (0 if deg==0)
      invd2    (Np, 1)            f32        1/deg, flow target->source
      per layer l:   wcat_l  (Cl_p, 3*Cout_p) MM_DTYPE   [W1 | W2 | Wroot]
                     broot_l (1, Cout_p)      f32
      per concat segment s (num_layers+1): wf_s (C_s_p, Cout_p) MM_DTYPE
      bf       (1, Cout_p)        f32
    Output ref:
      out      (Np, Cout_p)       f32   (doubles as the final-linear accumulator)
    """
    def kernel(*refs):
        x_ref, a_ref, invd1_ref, invd2_ref = refs[0], refs[1], refs[2], refs[3]
        wcat_refs = refs[4:4 + 2 * num_layers:2]
        br_refs = refs[5:5 + 2 * num_layers:2]
        base = 4 + 2 * num_layers
        wf_refs = refs[base:base + num_layers + 1]
        bf_ref = refs[base + num_layers + 1]
        out_ref = refs[-1]

        cur_mm = x_ref[...]                                # MM_DTYPE on entry

        # Final-linear accumulation replaces the explicit concat:
        #   concat(xs) @ Wf + bf == sum_s xs[s] @ Wf_segment[s] + bf
        # Accumulate directly into out_ref (VMEM f32) so no wide f32 accumulator
        # stays live across the statically unrolled layer loop.
        out_ref[...] = (jnp.dot(cur_mm, wf_refs[0][...],
                                preferred_element_type=jnp.float32) + bf_ref[...])

        for l in range(num_layers):                        # static unroll, all in VMEM
            # One wide MXU matmul for all three per-layer projections.
            h = jnp.dot(cur_mm, wcat_refs[l][...],
                        preferred_element_type=jnp.float32)
            h1 = h[:, 0 * cout_p:1 * cout_p].astype(MM_DTYPE)
            h2 = h[:, 1 * cout_p:2 * cout_p].astype(MM_DTYPE)
            root = h[:, 2 * cout_p:3 * cout_p] + br_refs[l][...]
            # Mean aggregation for both flows from the SINGLE adjacency A:
            #   agg1 = D1^-1 (A  @ h1)    (source -> target)
            #   agg2 = D2^-1 (A^T @ h2)   (target -> source), transposed-LHS contraction
            agg1 = invd1_ref[...] * jnp.dot(a_ref[...], h1,
                                            preferred_element_type=jnp.float32)
            agg2 = invd2_ref[...] * lax.dot_general(
                a_ref[...], h2,
                dimension_numbers=(((0,), (0,)), ((), ())),
                preferred_element_type=jnp.float32)
            cur = jnp.maximum(root + agg1 + agg2, 0.0)     # F.relu fused, f32 epilogue
            # TODO(synk): F.dropout(p=0.5) is stochastic; implemented as eval-mode identity.
            cur_mm = cur.astype(MM_DTYPE)                  # single convert, reused twice
            out_ref[...] = out_ref[...] + jnp.dot(
                cur_mm, wf_refs[l + 1][...], preferred_element_type=jnp.float32)

    return kernel


def fused_relcnn(x_p, a, invd1, invd2, wcats, broots, wf_segs, bf_p,
                 *, num_layers, cout_p):
    args = [x_p, a, invd1, invd2]
    for w, b in zip(wcats, broots):
        args += [w, b]
    args += list(wf_segs) + [bf_p]
    n_p = x_p.shape[0]
    kernel = _make_fused_kernel(num_layers, cout_p)
    # No grid: single invocation on whole-array VMEM refs -> inputs are
    # single-buffered (no pointless double-buffering of the N^2 adjacency) and the
    # concat is never materialized.
    # TODO(synk): for graphs whose dense N^2 adjacency approaches the VMEM budget
    # (especially v7x's 64 MiB), this needs a row/K-tiled pipeline (or a CSR gather
    # kernel with scalar prefetch) instead of whole-array residency, plus a row grid
    # marked "parallel" to engage v7x's second TensorCore.
    return pl.pallas_call(
        kernel,
        out_shape=jax.ShapeDtypeStruct((n_p, cout_p), jnp.float32),
        in_specs=[pl.BlockSpec(memory_space=pltpu.MemorySpace.VMEM) for _ in args],
        out_specs=pl.BlockSpec(memory_space=pltpu.MemorySpace.VMEM),
        compiler_params=pltpu.CompilerParams(
            vmem_limit_bytes=_vmem_budget_bytes(),
        ),
    )(*args)


# ------------------------------- JAX glue ---------------------------------- #

def build_adjacency(edge_index, n_p):
    """Single dense edge-count matrix plus f32 inverse degrees for both flows."""
    src, dst = edge_index[0], edge_index[1]
    # a[i, j] = number of edges j -> i  (flow 'source_to_target' aggregates at i=dst)
    a = jnp.zeros((n_p, n_p), jnp.float32).at[dst, src].add(1.0)
    d1 = a.sum(axis=-1, keepdims=True)              # deg for flow source->target
    d2 = a.sum(axis=0).reshape(n_p, 1)              # deg for flow target->source (A^T rows)
    invd1 = jnp.where(d1 > 0, 1.0 / jnp.maximum(d1, 1.0), 0.0)
    invd2 = jnp.where(d2 > 0, 1.0 / jnp.maximum(d2, 1.0), 0.0)
    # Counts are small integers -> exact in bf16; 1/deg stays f32 for accuracy.
    return a.astype(MM_DTYPE), invd1, invd2


def _lin_init(key, fan_in, fan_out, bias):
    """PyTorch nn.Linear default init (kaiming-uniform bound = 1/sqrt(fan_in))."""
    kw, kb = jax.random.split(key)
    bound = 1.0 / jnp.sqrt(jnp.float32(fan_in))
    w = jax.random.uniform(kw, (fan_in, fan_out), jnp.float32, -bound, bound)
    b = (jax.random.uniform(kb, (1, fan_out), jnp.float32, -bound, bound)
         if bias else None)
    return w, b


def init_graphc_params(key, input_dim, output_dim, num_layers):
    params = {"convs": []}
    cin = input_dim
    keys = jax.random.split(key, num_layers * 3 + 1)
    k = 0
    for _ in range(num_layers):
        w1, _ = _lin_init(keys[k], cin, output_dim, bias=False); k += 1
        w2, _ = _lin_init(keys[k], cin, output_dim, bias=False); k += 1
        wr, br = _lin_init(keys[k], cin, output_dim, bias=True); k += 1
        params["convs"].append({"w1": w1, "w2": w2, "wroot": wr, "broot": br})
        cin = output_dim
    cat_dim = input_dim + num_layers * output_dim   # cat=True, lin=True
    wf, bf = _lin_init(keys[k], cat_dim, output_dim, bias=True)
    params["final_w"], params["final_b"] = wf, bf
    return params


def pack_params(params, input_dim, output_dim, num_layers, use_w1_for_out2):
    """Pad channel dims to 128 lanes, fuse [W1|W2|Wroot], split the final linear
    into per-concat-segment slices, cast matmul operands to MM_DTYPE."""
    cin_p = _round_up(input_dim, LANE)
    cout_p = _round_up(output_dim, LANE)
    wcats, broots = [], []
    cinp = cin_p
    for layer in params["convs"]:
        w2 = layer["w1"] if use_w1_for_out2 else layer["w2"]
        wcat = jnp.concatenate(
            [_pad2(layer["w1"], cinp, cout_p),
             _pad2(w2, cinp, cout_p),
             _pad2(layer["wroot"], cinp, cout_p)], axis=1).astype(MM_DTYPE)
        wcats.append(wcat)
        broots.append(_pad2(layer["broot"], 1, cout_p))            # f32 epilogue
        cinp = cout_p
    wf, bf = params["final_w"], params["final_b"]
    segs = [_pad2(wf[:input_dim], cin_p, cout_p).astype(MM_DTYPE)]
    off = input_dim
    for _ in range(num_layers):
        segs.append(_pad2(wf[off:off + output_dim], cout_p, cout_p).astype(MM_DTYPE))
        off += output_dim
    return wcats, broots, segs, _pad2(bf, 1, cout_p), cin_p, cout_p


def graphc_forward(params, x, edge_index, edge_weight=None):
    n, input_dim = x.shape
    num_layers = len(params["convs"])
    output_dim = params["convs"][0]["w1"].shape[1]
    # Reference quirk replicated: when edge_weight is not None, out2 also uses lin1
    # and the `norm` kwarg is ignored (message() only consumes x_j).
    # TODO(synk): verify against real RelConv whether edge_weight should scale messages.
    wcats, broots, wf_segs, bf_p, cin_p, cout_p = pack_params(
        params, input_dim, output_dim, num_layers,
        use_w1_for_out2=(edge_weight is not None))
    n_p = _round_up(n, _node_align(n))
    x_p = _pad2(x, n_p, cin_p).astype(MM_DTYPE)
    a, invd1, invd2 = build_adjacency(edge_index, n_p)
    out_p = fused_relcnn(x_p, a, invd1, invd2, wcats, broots, wf_segs, bf_p,
                         num_layers=num_layers, cout_p=cout_p)
    # NOTE: padded node rows receive bias + ReLU inside the kernel but can never
    # contaminate real rows (their adjacency rows/cols and weight pads are zero);
    # slicing them off here is correct — this is wasted work on pad rows, not a bug.
    return out_p[:n, :output_dim]


# ---------------------------------- main ------------------------------------ #

if __name__ == "__main__":
    key = jax.random.PRNGKey(0)
    k_param, k_x, k_e = jax.random.split(key, 3)

    num_nodes = 16
    input_dim = 32
    output_dim = 32
    num_layers = 2
    num_edges = 24

    params = init_graphc_params(k_param, input_dim, output_dim, num_layers)
    x = jax.random.normal(k_x, (num_nodes, input_dim), jnp.float32)
    edge_index = jax.random.randint(k_e, (2, num_edges), 0, num_nodes, jnp.int32)

    out = graphc_forward(params, x, edge_index, edge_weight=None)
    jax.block_until_ready(out)
    assert out.shape == (num_nodes, output_dim)
    print("KERNEL_OK")
</pallas_src>

<mosaic_0001>
module attributes {stable_mosaic.version = 11 : i64} {
  func.func @kernel(%arg0: memref<16x128xbf16, #tpu.memory_space<vmem>>, %arg1: memref<16x16xbf16, #tpu.memory_space<vmem>>, %arg2: memref<16x1xf32, #tpu.memory_space<vmem>>, %arg3: memref<16x1xf32, #tpu.memory_space<vmem>>, %arg4: memref<128x384xbf16, #tpu.memory_space<vmem>>, %arg5: memref<1x128xf32, #tpu.memory_space<vmem>>, %arg6: memref<128x384xbf16, #tpu.memory_space<vmem>>, %arg7: memref<1x128xf32, #tpu.memory_space<vmem>>, %arg8: memref<128x128xbf16, #tpu.memory_space<vmem>>, %arg9: memref<128x128xbf16, #tpu.memory_space<vmem>>, %arg10: memref<128x128xbf16, #tpu.memory_space<vmem>>, %arg11: memref<1x128xf32, #tpu.memory_space<vmem>>, %arg12: memref<16x128xf32, #tpu.memory_space<vmem>>) attributes {dimension_semantics = [], scalar_prefetch = 0 : i64, scratch_operands = 0 : i64, tpu.core_type = #tpu.core_type<tc>} {
    %c0 = arith.constant 0 : index
    %c0_0 = arith.constant 0 : index
    %0 = vector.load %arg0[%c0, %c0_0] : memref<16x128xbf16, #tpu.memory_space<vmem>>, vector<16x128xbf16>
    %c0_1 = arith.constant 0 : index
    %c0_2 = arith.constant 0 : index
    %1 = vector.load %arg8[%c0_1, %c0_2] : memref<128x128xbf16, #tpu.memory_space<vmem>>, vector<128x128xbf16>
    %cst = arith.constant dense<0.000000e+00> : vector<16x128xf32>
    %2 = tpu.matmul %0, %1, %cst {dimension_numbers = #tpu.dot_dimension_numbers<[1], [0], [0], [1], [0, 0, 1, 1], [], []>} : vector<16x128xbf16>, vector<128x128xbf16>, vector<16x128xf32> -> vector<16x128xf32>
    %c0_3 = arith.constant 0 : index
    %c0_4 = arith.constant 0 : index
    %3 = vector.load %arg11[%c0_3, %c0_4] : memref<1x128xf32, #tpu.memory_space<vmem>>, vector<1x128xf32>
    %4 = vector.broadcast %3 : vector<1x128xf32> to vector<16x128xf32>
    %5 = arith.addf %2, %4 : vector<16x128xf32>
    %c0_5 = arith.constant 0 : index
    %c0_6 = arith.constant 0 : index
    %6 = vector.load %arg12[%c0_5, %c0_6] : memref<16x128xf32, #tpu.memory_space<vmem>>, vector<16x128xf32>
    tpu.vector_store %arg12[%c0_5, %c0_6], %5 {strides = array<i32>} : memref<16x128xf32, #tpu.memory_space<vmem>>, vector<16x128xf32>,
    %c0_7 = arith.constant 0 : index
    %c0_8 = arith.constant 0 : index
    %7 = vector.load %arg4[%c0_7, %c0_8] : memref<128x384xbf16, #tpu.memory_space<vmem>>, vector<128x384xbf16>
    %cst_9 = arith.constant dense<0.000000e+00> : vector<16x384xf32>
    %8 = tpu.matmul %0, %7, %cst_9 {dimension_numbers = #tpu.dot_dimension_numbers<[1], [0], [0], [1], [0, 0, 1, 1], [], []>} : vector<16x128xbf16>, vector<128x384xbf16>, vector<16x384xf32> -> vector<16x384xf32>
    %9 = vector.extract_strided_slice %8 {offsets = [0, 0], sizes = [16, 128], strides = [1, 1]} : vector<16x384xf32> to vector<16x128xf32>
    %10 = arith.truncf %9 : vector<16x128xf32> to vector<16x128xbf16>
    %11 = vector.extract_strided_slice %8 {offsets = [0, 128], sizes = [16, 128], strides = [1, 1]} : vector<16x384xf32> to vector<16x128xf32>
    %12 = arith.truncf %11 : vector<16x128xf32> to vector<16x128xbf16>
    %13 = vector.extract_strided_slice %8 {offsets = [0, 256], sizes = [16, 128], strides = [1, 1]} : vector<16x384xf32> to vector<16x128xf32>
    %c0_10 = arith.constant 0 : index
    %c0_11 = arith.constant 0 : index
    %14 = vector.load %arg5[%c0_10, %c0_11] : memref<1x128xf32, #tpu.memory_space<vmem>>, vector<1x128xf32>
    %15 = vector.broadcast %14 : vector<1x128xf32> to vector<16x128xf32>
    %16 = arith.addf %13, %15 : vector<16x128xf32>
    %c0_12 = arith.constant 0 : index
    %c0_13 = arith.constant 0 : index
    %17 = vector.load %arg2[%c0_12, %c0_13] : memref<16x1xf32, #tpu.memory_space<vmem>>, vector<16x1xf32>
    %c0_14 = arith.constant 0 : index
    %c0_15 = arith.constant 0 : index
    %18 = vector.load %arg1[%c0_14, %c0_15] : memref<16x16xbf16, #tpu.memory_space<vmem>>, vector<16x16xbf16>
    %cst_16 = arith.constant dense<0.000000e+00> : vector<16x128xf32>
    %19 = tpu.matmul %18, %10, %cst_16 {dimension_numbers = #tpu.dot_dimension_numbers<[1], [0], [0], [1], [0, 0, 1, 1], [], []>} : vector<16x16xbf16>, vector<16x128xbf16>, vector<16x128xf32> -> vector<16x128xf32>
    %20 = vector.broadcast %17 : vector<16x1xf32> to vector<16x128xf32>
    %21 = arith.mulf %20, %19 : vector<16x128xf32>
    %c0_17 = arith.constant 0 : index
    %c0_18 = arith.constant 0 : index
    %22 = vector.load %arg3[%c0_17, %c0_18] : memref<16x1xf32, #tpu.memory_space<vmem>>, vector<16x1xf32>
    %c0_19 = arith.constant 0 : index
    %c0_20 = arith.constant 0 : index
    %23 = vector.load %arg1[%c0_19, %c0_20] : memref<16x16xbf16, #tpu.memory_space<vmem>>, vector<16x16xbf16>
    %cst_21 = arith.constant dense<0.000000e+00> : vector<16x128xf32>
    %24 = tpu.matmul %23, %12, %cst_21 {dimension_numbers = #tpu.dot_dimension_numbers<[0], [0], [1], [1], [0, 1, 1, 1], [], []>} : vector<16x16xbf16>, vector<16x128xbf16>, vector<16x128xf32> -> vector<16x128xf32>
    %25 = vector.broadcast %22 : vector<16x1xf32> to vector<16x128xf32>
    %26 = arith.mulf %25, %24 : vector<16x128xf32>
    %27 = arith.addf %16, %21 : vector<16x128xf32>
    %28 = arith.addf %27, %26 : vector<16x128xf32>
    %cst_22 = arith.constant 0.000000e+00 : f32
    %29 = vector.broadcast %cst_22 : f32 to vector<16x128xf32>
    %30 = arith.maximumf %28, %29 : vector<16x128xf32>
    %31 = arith.truncf %30 : vector<16x128xf32> to vector<16x128xbf16>
    %c0_23 = arith.constant 0 : index
    %c0_24 = arith.constant 0 : index
    %32 = vector.load %arg12[%c0_23, %c0_24] : memref<16x128xf32, #tpu.memory_space<vmem>>, vector<16x128xf32>
    %c0_25 = arith.constant 0 : index
    %c0_26 = arith.constant 0 : index
    %33 = vector.load %arg9[%c0_25, %c0_26] : memref<128x128xbf16, #tpu.memory_space<vmem>>, vector<128x128xbf16>
    %cst_27 = arith.constant dense<0.000000e+00> : vector<16x128xf32>
    %34 = tpu.matmul %31, %33, %cst_27 {dimension_numbers = #tpu.dot_dimension_numbers<[1], [0], [0], [1], [0, 0, 1, 1], [], []>} : vector<16x128xbf16>, vector<128x128xbf16>, vector<16x128xf32> -> vector<16x128xf32>
    %35 = arith.addf %32, %34 : vector<16x128xf32>
    %c0_28 = arith.constant 0 : index
    %c0_29 = arith.constant 0 : index
    %36 = vector.load %arg12[%c0_28, %c0_29] : memref<16x128xf32, #tpu.memory_space<vmem>>, vector<16x128xf32>
    tpu.vector_store %arg12[%c0_28, %c0_29], %35 {strides = array<i32>} : memref<16x128xf32, #tpu.memory_space<vmem>>, vector<16x128xf32>,
    %c0_30 = arith.constant 0 : index
    %c0_31 = arith.constant 0 : index
    %37 = vector.load %arg6[%c0_30, %c0_31] : memref<128x384xbf16, #tpu.memory_space<vmem>>, vector<128x384xbf16>
    %cst_32 = arith.constant dense<0.000000e+00> : vector<16x384xf32>
    %38 = tpu.matmul %31, %37, %cst_32 {dimension_numbers = #tpu.dot_dimension_numbers<[1], [0], [0], [1], [0, 0, 1, 1], [], []>} : vector<16x128xbf16>, vector<128x384xbf16>, vector<16x384xf32> -> vector<16x384xf32>
    %39 = vector.extract_strided_slice %38 {offsets = [0, 0], sizes = [16, 128], strides = [1, 1]} : vector<16x384xf32> to vector<16x128xf32>
    %40 = arith.truncf %39 : vector<16x128xf32> to vector<16x128xbf16>
    %41 = vector.extract_strided_slice %38 {offsets = [0, 128], sizes = [16, 128], strides = [1, 1]} : vector<16x384xf32> to vector<16x128xf32>
    %42 = arith.truncf %41 : vector<16x128xf32> to vector<16x128xbf16>
    %43 = vector.extract_strided_slice %38 {offsets = [0, 256], sizes = [16, 128], strides = [1, 1]} : vector<16x384xf32> to vector<16x128xf32>
    %c0_33 = arith.constant 0 : index
    %c0_34 = arith.constant 0 : index
    %44 = vector.load %arg7[%c0_33, %c0_34] : memref<1x128xf32, #tpu.memory_space<vmem>>, vector<1x128xf32>
    %45 = vector.broadcast %44 : vector<1x128xf32> to vector<16x128xf32>
    %46 = arith.addf %43, %45 : vector<16x128xf32>
    %c0_35 = arith.constant 0 : index
    %c0_36 = arith.constant 0 : index
    %47 = vector.load %arg2[%c0_35, %c0_36] : memref<16x1xf32, #tpu.memory_space<vmem>>, vector<16x1xf32>
    %c0_37 = arith.constant 0 : index
    %c0_38 = arith.constant 0 : index
    %48 = vector.load %arg1[%c0_37, %c0_38] : memref<16x16xbf16, #tpu.memory_space<vmem>>, vector<16x16xbf16>
    %cst_39 = arith.constant dense<0.000000e+00> : vector<16x128xf32>
    %49 = tpu.matmul %48, %40, %cst_39 {dimension_numbers = #tpu.dot_dimension_numbers<[1], [0], [0], [1], [0, 0, 1, 1], [], []>} : vector<16x16xbf16>, vector<16x128xbf16>, vector<16x128xf32> -> vector<16x128xf32>
    %50 = vector.broadcast %47 : vector<16x1xf32> to vector<16x128xf32>
    %51 = arith.mulf %50, %49 : vector<16x128xf32>
    %c0_40 = arith.constant 0 : index
    %c0_41 = arith.constant 0 : index
    %52 = vector.load %arg3[%c0_40, %c0_41] : memref<16x1xf32, #tpu.memory_space<vmem>>, vector<16x1xf32>
    %c0_42 = arith.constant 0 : index
    %c0_43 = arith.constant 0 : index
    %53 = vector.load %arg1[%c0_42, %c0_43] : memref<16x16xbf16, #tpu.memory_space<vmem>>, vector<16x16xbf16>
    %cst_44 = arith.constant dense<0.000000e+00> : vector<16x128xf32>
    %54 = tpu.matmul %53, %42, %cst_44 {dimension_numbers = #tpu.dot_dimension_numbers<[0], [0], [1], [1], [0, 1, 1, 1], [], []>} : vector<16x16xbf16>, vector<16x128xbf16>, vector<16x128xf32> -> vector<16x128xf32>
    %55 = vector.broadcast %52 : vector<16x1xf32> to vector<16x128xf32>
    %56 = arith.mulf %55, %54 : vector<16x128xf32>
    %57 = arith.addf %46, %51 : vector<16x128xf32>
    %58 = arith.addf %57, %56 : vector<16x128xf32>
    %cst_45 = arith.constant 0.000000e+00 : f32
    %59 = vector.broadcast %cst_45 : f32 to vector<16x128xf32>
    %60 = arith.maximumf %58, %59 : vector<16x128xf32>
    %61 = arith.truncf %60 : vector<16x128xf32> to vector<16x128xbf16>
    %c0_46 = arith.constant 0 : index
    %c0_47 = arith.constant 0 : index
    %62 = vector.load %arg12[%c0_46, %c0_47] : memref<16x128xf32, #tpu.memory_space<vmem>>, vector<16x128xf32>
    %c0_48 = arith.constant 0 : index
    %c0_49 = arith.constant 0 : index
    %63 = vector.load %arg10[%c0_48, %c0_49] : memref<128x128xbf16, #tpu.memory_space<vmem>>, vector<128x128xbf16>
    %cst_50 = arith.constant dense<0.000000e+00> : vector<16x128xf32>
    %64 = tpu.matmul %61, %63, %cst_50 {dimension_numbers = #tpu.dot_dimension_numbers<[1], [0], [0], [1], [0, 0, 1, 1], [], []>} : vector<16x128xbf16>, vector<128x128xbf16>, vector<16x128xf32> -> vector<16x128xf32>
    %65 = arith.addf %62, %64 : vector<16x128xf32>
    %c0_51 = arith.constant 0 : index
    %c0_52 = arith.constant 0 : index
    %66 = vector.load %arg12[%c0_51, %c0_52] : memref<16x128xf32, #tpu.memory_space<vmem>>, vector<16x128xf32>
    tpu.vector_store %arg12[%c0_51, %c0_52], %65 {strides = array<i32>} : memref<16x128xf32, #tpu.memory_space<vmem>>, vector<16x128xf32>,
    return
  }
}

</mosaic_0001>

<bundles_post_ra>
// kernel: tpu_custom_call.1
= control target key start
LH: loop header
LB: loop body
LE: loop exit
PB: predicated region body
PF: predicated region fallthrough
CT: control target
= control target key end

     0   :  { %17 = vsyncpa [#allocation3], 0  ;;  %s2001_s0 = inlined_call_operand.vmem [shape: bf16[16,128], index: 0, kind: input, shape index: {}]   ;;  %s2002_s1 = inlined_call_operand.vmem [shape: bf16[16,16], index: 1, kind: input, shape index: {}]   ;;  %s2003_s2 = inlined_call_operand.vmem [shape: f32[16,1], index: 2, kind: input, shape index: {}]   ;;  %s2004_s3 = inlined_call_operand.vmem [shape: f32[16,1], index: 3, kind: input, shape index: {}]   ;;  %s2005_s4 = inlined_call_operand.hbm [shape: bf16[128,384], index: 4, kind: input, shape index: {}]   ;;  %s2006_s5 = inlined_call_operand.vmem [shape: f32[1,128], index: 5, kind: input, shape index: {}]   ;;  %s2007_s6 = inlined_call_operand.hbm [shape: bf16[128,384], index: 6, kind: input, shape index: {}]   ;;  %s2008_s7 = inlined_call_operand.vmem [shape: f32[1,128], index: 7, kind: input, shape index: {}]   ;;  %s2009_s8 = inlined_call_operand.hbm [shape: bf16[128,128], index: 8, kind: input, shape index: {}]   ;;  %s2010_s9 = inlined_call_operand.hbm [shape: bf16[128,128], index: 9, kind: input, shape index: {}]   ;;  %s2011_s10 = inlined_call_operand.hbm [shape: bf16[128,128], index: 10, kind: input, shape index: {}]   ;;  %s2012_s11 = inlined_call_operand.vmem [shape: f32[1,128], index: 11, kind: input, shape index: {}]   ;;  %s2013_s12 = inlined_call_operand.hbm [shape: f32[16,128], index: 12, kind: output, shape index: {}]  }
   0x1   :  { %18 = vsyncpa [#allocation6], 0 }
   0x2   :  { %19 = vsyncpa [#allocation9], 0 }
   0x3   :  { %20 = vsyncpa [#allocation4], 0  ;;  %s1774_s21 = smov [#allocation5]  }
   0x4   :  { %s48_s22 = sshll.u32 %s1774_s21, 4  ;;  %s49_s22 = int_to_ptr.vmem [resolvable:$true] %s48_s22 }
   0x5   :  { %s1654_s23 = scalar_lea.vmem %s49_s22, 3072  ;;  %p1659_p1 = scmp.lt.s32.totalorder %s49_s22, %s49_s22 }
   0x6   :  { %p1655_p0 = scmp.ne.s32.totalorder %s49_s22, %s1654_s23  ;;  %p1660_p2 = scmp.lt.s32.totalorder %s1654_s23, %s1654_s23 }
   0x8   :  { %p1661_p3 = por %p1660_p2, %p1659_p1 }
   0xa   :  { %p1662_p4 = pnand %p1661_p3, %p1655_p0 }
   0xc   :  { %1665 = shalt.err (!%p1662_p4)
}
   0xd   :  { %s1775_s24 = smov 192   ;;  %s1776_s25 = smov 12  }
   0xe   :  { %54 = dma.hbm_to_vmem [thread:$0]  %s2007_s6, 3072, %s49_s22, [#allocation6], %s1775_s24, %s1775_s24, %s1776_s25  }
   0xf   :  { %s1777_s28 = smov [#allocation8]   ;;  %s1778_s30 = smov [#allocation2]  }
  0x10   :  { %s74_s29 = sshll.u32 %s1777_s28, 4  ;;  %s34_s13 = sshll.u32 %s1778_s30, 4  ;;  %s75_s29 = int_to_ptr.vmem [resolvable:$true] %s74_s29  ;;  %s35_s13 = int_to_ptr.vmem [resolvable:$true] %s34_s13 }
  0x11   :  { %s1674_s14 = scalar_lea.vmem %s75_s29, 1024  ;;  %p1679_p6 = scmp.lt.s32.totalorder %s75_s29, %s75_s29 }
  0x12   :  { %p1675_p5 = scmp.ne.s32.totalorder %s75_s29, %s1674_s14  ;;  %p1680_p7 = scmp.lt.s32.totalorder %s1674_s14, %s1674_s14 }
  0x14   :  { %p1681_p8 = por %p1680_p7, %p1679_p6 }
  0x16   :  { %p1682_p9 = pnand %p1681_p8, %p1675_p5 }
  0x18   :  { %1685 = shalt.err (!%p1682_p9)
}
  0x19   :  { %s1779_s15 = smov 64   ;;  %s1780_s16 = smov 4  }
  0x1a   :  { %80 = dma.hbm_to_vmem [thread:$0]  %s2010_s9, 1024, %s75_s29, [#allocation9], %s1779_s15, %s1779_s15, %s1780_s16  }
  0x1b   :  { %s1694_s6 = scalar_lea.vmem %s35_s13, 3072  ;;  %p1699_p11 = scmp.lt.s32.totalorder %s35_s13, %s35_s13 }
  0x1c   :  { %p1695_p10 = scmp.ne.s32.totalorder %s35_s13, %s1694_s6  ;;  %p1700_p12 = scmp.lt.s32.totalorder %s1694_s6, %s1694_s6 }
  0x1e   :  { %p1701_p13 = por %p1700_p12, %p1699_p11 }
  0x20   :  { %p1702_p0 = pnand %p1701_p13, %p1695_p10 }
  0x22   :  { %1705 = shalt.err (!%p1702_p0)
}
  0x23   :  { %40 = dma.hbm_to_vmem [thread:$0]  %s2005_s4, 3072, %s35_s13, [#allocation3], %s1775_s24, %s1775_s24, %s1776_s25  }
  0x24   :  { %s1781_s21 = smov [#allocation7]   ;;  %s1782_s23 = smov [#allocation10]  }
  0x25   :  { %s62_s22 = sshll.u32 %s1781_s21, 4  ;;  %s86_s26 = sshll.u32 %s1782_s23, 4  ;;  %s63_s22 = int_to_ptr.vmem [resolvable:$true] %s62_s22  ;;  %s87_s26 = int_to_ptr.vmem [resolvable:$true] %s86_s26 }
  0x26   :  { %s1714_s27 = scalar_lea.vmem %s63_s22, 1024  ;;  %p1719_p2 = scmp.lt.s32.totalorder %s63_s22, %s63_s22 }
  0x27   :  { %p1715_p1 = scmp.ne.s32.totalorder %s63_s22, %s1714_s27  ;;  %p1720_p3 = scmp.lt.s32.totalorder %s1714_s27, %s1714_s27 }
  0x29   :  { %p1721_p4 = por %p1720_p3, %p1719_p2 }
  0x2b   :  { %p1722_p5 = pnand %p1721_p4, %p1715_p1 }
  0x2d   :  { %1725 = shalt.err (!%p1722_p5)
}
  0x2e   :  { %68 = dma.hbm_to_vmem [thread:$0]  %s2009_s8, 1024, %s63_s22, [#allocation6], %s1779_s15, %s1779_s15, %s1780_s16  }
  0x2f   :  { %s1734_s4 = scalar_lea.vmem %s87_s26, 1024  ;;  %p1739_p7 = scmp.lt.s32.totalorder %s87_s26, %s87_s26 }
  0x30   :  { %p1735_p6 = scmp.ne.s32.totalorder %s87_s26, %s1734_s4  ;;  %p1740_p8 = scmp.lt.s32.totalorder %s1734_s4, %s1734_s4 }
  0x32   :  { %p1741_p9 = por %p1740_p8, %p1739_p7 }
  0x34   :  { %p1742_p10 = pnand %p1741_p9, %p1735_p6 }
  0x36   :  { %1745 = shalt.err (!%p1742_p10)
}
  0x37   :  { %92 = dma.hbm_to_vmem [thread:$0]  %s2011_s10, 1024, %s87_s26, [#allocation9], %s1779_s15, %s1779_s15, %s1780_s16  }
  0x38   :  { %1766 = dma.done.wait [#allocation3], 3072  }
  0x39   :  { %1767 = vsyncadd [#allocation3], 4294964224 }
  0x3a   :  { %1768 = dma.done.wait [#allocation6], 4096  }
  0x3b   :  { %1769 = vsyncadd [#allocation6], 4294963200 }
  0x3c   :  { %1770 = dma.done.wait [#allocation9], 2048  }
  0x3d   :  { %1771 = vsyncadd [#allocation9], 4294965248  ;;  %v1783_v0 = vmov 0   ;;  %v1784_v1 = vmov 0.0   ;;  %vm1785_vm0 = vmmov 0   ;;  %v1886_v11 = vld [vmem:[%s2002_s1] sm:$0xff]  }
  0x3e   :  { %425 = vmatprep.mubr.bf16.mxu1 %v1783_v0  ;;  %1414 = vmatprep.subr.bf16.mxu0 %v1784_v1  ;;  %v1555_v2 = vld [vmem:[#allocation2 + $0xac] ss:$12 sps:$4 sm:$0xff]   ;;  %v1557_v3 = vld [vmem:[#allocation2 + $0xa8] ss:$12 sps:$4 sm:$0xff]   ;;  %v1560_v5 = vld [vmem:[#allocation2 + $0x90] ss:$12 sps:$4 sm:$0xff]  }
  0x3f   :  { %1430 = vmatprep.mubr.msk.bf16.mxu0 %vm1785_vm0, %v1784_v1  ;;  %1554 = vset.pattern.permute.xlu1 %v1783_v0  ;;  %v1558_v4 = vld [vmem:[#allocation2 + $0x94] ss:$12 sps:$4 sm:$0xff]   ;;  %v1561_v6 = vld [vmem:[#allocation2 + $0x7c] ss:$12 sps:$4 sm:$0xff]   ;;  %v1563_v7 = vld [vmem:[#allocation2 + $0x78] ss:$12 sps:$4 sm:$0xff]  }
  0x40   :  { %393 = vmatprep.subr.bf16.mxu1 %v1555_v2  ;;  %v1564_v8 = vld [vmem:[#allocation2 + $0x64] ss:$12 sps:$4 sm:$0xff]   ;;  %v1566_v9 = vld [vmem:[#allocation2 + $0x60] ss:$12 sps:$4 sm:$0xff]   ;;  %v1569_v12 = vld [vmem:[#allocation2 + $0x48] ss:$12 sps:$4 sm:$0xff]  }
  0x41   :  { %394 = vmatpush1.bf16.msra.mxu1 %v1557_v3  ;;  %v1567_v10 = vld [vmem:[#allocation2 + $0x4c] ss:$12 sps:$4 sm:$0xff]   ;;  %557 = vxpose.xlu0.c.b16.start.end [1/1] (short) (narrow) %v1886_v11, 16  ;;  %v1582_v14 = vld [vmem:[#allocation7 + $0x30] sm:$0xff]   ;;  %v1573_v18 = vld [vmem:[#allocation2 + $0x1c] ss:$12 sps:$4 sm:$0xff]  }
  0x42   :  { %395 = vmatprep.subr.bf16.mxu1 %v1558_v4  ;;  %v1581_v13 = vld [vmem:[#allocation7 + $0x38] sm:$0xff]   ;;  %v1570_v15 = vld [vmem:[#allocation2 + $0x34] ss:$12 sps:$4 sm:$0xff]   ;;  %v1583_v17 = vld [vmem:[#allocation7 + $0x28] sm:$0xff]   ;;  %vm497_vm1 = vcmask 130048  }
  0x43   :  { %1415 = vmatpush3.bf16.msra.mxu0 %v1581_v13  ;;  %v1572_v16 = vld [vmem:[#allocation2 + $0x30] ss:$12 sps:$4 sm:$0xff]   ;;  %v1575_v19 = vld [vmem:[#allocation2 + $0x18] ss:$12 sps:$4 sm:$0xff]   ;;  %v1578_v22 = vld [vmem:[#allocation2] ss:$12 sps:$4 sm:$0xff]  }
  0x44   :  { %1416 = vmatprep.subr.bf16.mxu0 %v1784_v1  ;;  %v1584_v20 = vld [vmem:[#allocation7 + $0x20] sm:$0xff]   ;;  %v1585_v23 = vld [vmem:[#allocation7 + $0x18] sm:$0xff]   ;;  %v1586_v25 = vld [vmem:[#allocation7 + $0x10] sm:$0xff]  }
  0x45   :  { %396 = vmatpush1.bf16.msra.mxu1 %v1560_v5  ;;  %v1576_v21 = vld [vmem:[#allocation2 + $0x4] ss:$12 sps:$4 sm:$0xff]   ;;  %v1587_v26 = vld [vmem:[#allocation7 + $0x8] sm:$0xff]   ;;  %v1604_v41 = vld [vmem:[#allocation5 + $0x94] ss:$12 sps:$4 sm:$0xff]  }
  0x46   :  { %397 = vmatprep.subr.bf16.mxu1 %v1561_v6  ;;  %v1579_v24 = vld [vmem:[%s2001_s0] sm:$0xff]   ;;  %v1589_v28 = vld [vmem:[#allocation2 + $0xb0] ss:$12 sps:$4 sm:$0xff]   ;;  %v1592_v31 = vld [vmem:[#allocation2 + $0x68] ss:$12 sps:$4 sm:$0xff]  }
  0x47   :  { %1417 = vmatpush3.bf16.msra.mxu0 %v1582_v14  ;;  %v1588_v27 = vld [vmem:[#allocation7] sm:$0xff]   ;;  %v1593_v32 = vld [vmem:[#allocation2 + $0x50] ss:$12 sps:$4 sm:$0xff]   ;;  %v1596_v35 = vld [vmem:[#allocation2 + $0x8] ss:$12 sps:$4 sm:$0xff]  }
  0x48   :  { %1418 = vmatprep.subr.bf16.mxu0 %v1784_v1  ;;  %v1590_v29 = vld [vmem:[#allocation2 + $0x98] ss:$12 sps:$4 sm:$0xff]   ;;  %v1591_v30 = vld [vmem:[#allocation2 + $0x80] ss:$12 sps:$4 sm:$0xff]   ;;  %v1598_v39 = vld [vmem:[#allocation5 + $0xa8] ss:$12 sps:$4 sm:$0xff]  }
  0x49   :  { %398 = vmatpush1.bf16.msra.mxu1 %v1563_v7  ;;  %v1594_v33 = vld [vmem:[#allocation2 + $0x38] ss:$12 sps:$4 sm:$0xff]   ;;  %v1595_v34 = vld [vmem:[#allocation2 + $0x20] ss:$12 sps:$4 sm:$0xff]   ;;  %v1602_v43 = vld [vmem:[#allocation5 + $0x90] ss:$12 sps:$4 sm:$0xff]  }
  0x4a   :  { %399 = vmatprep.subr.bf16.mxu1 %v1564_v8  ;;  %1553 = vset.pattern.permute.xlu0 %v1783_v0  ;;  %v488_v36 = vld [vmem:[%s2003_s2] sm:$0xff]  ;;  %v489_v37 = vld [vmem:[%s2003_s2 + $0x8] sm:$0xff]  ;;  %v1597_v55 = vld [vmem:[#allocation8 + $0x38] sm:$0xff]  }
  0x4b   :  { %1419 = vmatpush3.bf16.msra.mxu0 %v1583_v17  ;;  %544 = vperm.xlu0 %1553, %v488_v36   ;;  %v554_v38 = vld [vmem:[%s2004_s3] sm:$0xff]  ;;  %v1600_v40 = vld [vmem:[#allocation5 + $0xac] ss:$12 sps:$4 sm:$0xff]   ;;  %v1608_v44 = vld [vmem:[#allocation5 + $0x7c] ss:$12 sps:$4 sm:$0xff]  }
  0x4c   :  { %1420 = vmatprep.subr.bf16.mxu0 %v1784_v1  ;;  %549 = vperm.xlu1 %1554, %v489_v37   ;;  %v555_v42 = vld [vmem:[%s2004_s3 + $0x8] sm:$0xff]  ;;  %v1606_v45 = vld [vmem:[#allocation5 + $0x78] ss:$12 sps:$4 sm:$0xff]   ;;  %v1601_v58 = vld [vmem:[#allocation8 + $0x30] sm:$0xff]  }
  0x4d   :  { %400 = vmatpush1.bf16.msra.mxu1 %v1566_v9  ;;  %v1605_v59 = vld [vmem:[#allocation8 + $0x28] sm:$0xff]   ;;  %v1609_v60 = vld [vmem:[#allocation8 + $0x20] sm:$0xff]   ;;  %v1613_v2 = vld [vmem:[#allocation8 + $0x18] sm:$0xff]  }
  0x4e   :  { %401 = vmatprep.subr.bf16.mxu1 %v1567_v10  ;;  %v1612_v61 = vld [vmem:[#allocation5 + $0x64] ss:$12 sps:$4 sm:$0xff]   ;;  %v1610_v63 = vld [vmem:[#allocation5 + $0x60] ss:$12 sps:$4 sm:$0xff]   ;;  %v1614_v5 = vld [vmem:[#allocation5 + $0x48] ss:$12 sps:$4 sm:$0xff]  }
  0x4f   :  { %1421 = vmatpush3.bf16.msra.mxu0 %v1584_v20  ;;  %1057 = vperm.xlu0 %1553, %v488_v36   ;;  %v1616_v3 = vld [vmem:[#allocation5 + $0x4c] ss:$12 sps:$4 sm:$0xff]   ;;  %v1617_v7 = vld [vmem:[#allocation8 + $0x10] sm:$0xff]   ;;  %v1625_v13 = vld [vmem:[#allocation8] sm:$0xff]  }
  0x50   :  { %1422 = vmatprep.subr.bf16.mxu0 %v1784_v1  ;;  %619 = vperm.xlu1 %1554, %v554_v38   ;;  %v1620_v8 = vld [vmem:[#allocation5 + $0x34] ss:$12 sps:$4 sm:$0xff]   ;;  %v1618_v9 = vld [vmem:[#allocation5 + $0x30] ss:$12 sps:$4 sm:$0xff]   ;;  %v1621_v10 = vld [vmem:[#allocation8 + $0x8] sm:$0xff]  }
  0x51   :  { %402 = vmatpush1.bf16.msra.mxu1 %v1569_v12  ;;  %v1622_v12 = vld [vmem:[#allocation5 + $0x18] ss:$12 sps:$4 sm:$0xff]   ;;  %v1313_v20 = vld [vmem:[%s2006_s5] ss:$0 sm:$0xff] }
  0x52   :  { %403 = vmatprep.subr.bf16.mxu1 %v1570_v15  ;;  %v1628_v14 = vld [vmem:[#allocation5 + $0x4] ss:$12 sps:$4 sm:$0xff]   ;;  %v1626_v15 = vld [vmem:[#allocation5] ss:$12 sps:$4 sm:$0xff]  }
  0x53   :  { %1423 = vmatpush3.bf16.msra.mxu0 %v1585_v23  ;;  %1062 = vperm.xlu0 %1553, %v489_v37  }
  0x54   :  { %1424 = vmatprep.subr.bf16.mxu0 %v1784_v1  ;;  %624 = vperm.xlu1 %1554, %v555_v42  }
  0x55   :  { %404 = vmatpush1.bf16.msra.mxu1 %v1572_v16  ;;  %v1951_v16 = vld [vmem:[%s2002_s1] sm:$0xff]  }
  0x56   :  { %405 = vmatprep.subr.bf16.mxu1 %v1573_v18 }
  0x57   :  { %1425 = vmatpush3.bf16.msra.mxu0 %v1586_v25  ;;  %1132 = vperm.xlu0 %1553, %v554_v38  }
  0x58   :  { %1426 = vmatprep.subr.bf16.mxu0 %v1784_v1 }
  0x59   :  { %406 = vmatpush1.bf16.msra.mxu1 %v1575_v19 }
  0x5a   :  { %407 = vmatprep.subr.bf16.mxu1 %v1576_v21 }
  0x5b   :  { %1427 = vmatpush3.bf16.msra.mxu0 %v1587_v26  ;;  %1137 = vperm.xlu0 %1553, %v555_v42   ;;  %v1629_v42 = vld [vmem:[#allocation5 + $0xb0] ss:$12 sps:$4 sm:$0xff]  }
  0x5c   :  { %1428 = vmatprep.subr.bf16.mxu0 %v1784_v1 }
  0x5d   :  { %408 = vmatpush1.bf16.msra.mxu1 %v1578_v22 }
  0x5e   :  { %1454 = vmatprep.subr.bf16.mxu1 %v1784_v1 }
  0x5f   :  { %1429 = vmatpush3.bf16.msra.mxu0 %v1588_v27 }
  0x60   :  { %426 = vmatmul.mubr.bf16.vlgmr.msra.gmra.mxu1 %v1579_v24  ;;  %1434 = vmatprep.subr.bf16.mxu0 %v1784_v1 }
  0x61   :  { %1456 = vmatprep.mubr.msk.bf16.mxu1 %vm1785_vm0, %v1784_v1 }
  0x62   :  { %1431 = vmatmul.mubr.bf16.vlgmr.msra.gmra.mxu0 %v1579_v24 }
  0x63   :  { %1435 = vmatpush3.bf16.msra.mxu0 %v1589_v28  ;;  %1450 = vmatprep.mubr.msk.bf16.mxu0 %vm1785_vm0, %v1784_v1 }
  0x64   :  { %1436 = vmatprep.subr.bf16.mxu0 %v1784_v1 }
  0x67   :  { %1437 = vmatpush3.bf16.msra.mxu0 %v1590_v29 }
  0x68   :  { %1438 = vmatprep.subr.bf16.mxu0 %v1784_v1 }
  0x6b   :  { %1439 = vmatpush3.bf16.msra.mxu0 %v1591_v30 }
  0x6c   :  { %1440 = vmatprep.subr.bf16.mxu0 %v1784_v1 }
  0x6f   :  { %1441 = vmatpush3.bf16.msra.mxu0 %v1592_v31 }
  0x70   :  { %1442 = vmatprep.subr.bf16.mxu0 %v1784_v1 }
  0x73   :  { %1443 = vmatpush3.bf16.msra.mxu0 %v1593_v32 }
  0x74   :  { %1444 = vmatprep.subr.bf16.mxu0 %v1784_v1 }
  0x77   :  { %1445 = vmatpush3.bf16.msra.mxu0 %v1594_v33  ;;  %1070 = vxpose.xlu1.c.b16.start.end [1/1] (short) (narrow) %v1951_v16, 16 }
  0x78   :  { %1446 = vmatprep.subr.bf16.mxu0 %v1784_v1 }
  0x7b   :  { %1447 = vmatpush3.bf16.msra.mxu0 %v1595_v34 }
  0x7c   :  { %1448 = vmatprep.subr.bf16.mxu0 %v1784_v1 }
  0x7f   :  { %1449 = vmatpush3.bf16.msra.mxu0 %v1596_v35 }
  0x80   :  { %907 = vmatprep.subr.bf16.mxu0 %v1600_v40 }
  0x82   :  { %1451 = vmatmul.mubr.bf16.vlgmr.msra.gmra.mxu0 %v1579_v24 }
  0x83   :  { %939 = vmatprep.mubr.bf16.mxu0 %v1783_v0  ;;  %908 = vmatpush1.bf16.msra.mxu0 %v1598_v39 }
  0x84   :  { %909 = vmatprep.subr.bf16.mxu0 %v1604_v41 }
  0x87   :  { %910 = vmatpush1.bf16.msra.mxu0 %v1602_v43 }
  0x88   :  { %911 = vmatprep.subr.bf16.mxu0 %v1608_v44  ;;  %v1630_v44 = vld [vmem:[#allocation5 + $0x98] ss:$12 sps:$4 sm:$0xff]  }
  0x8b   :  { %912 = vmatpush1.bf16.msra.mxu0 %v1606_v45  ;;  %v1631_v45 = vld [vmem:[#allocation5 + $0x80] ss:$12 sps:$4 sm:$0xff]  }
  0x8c   :  { %913 = vmatprep.subr.bf16.mxu0 %v1612_v61 }
  0x8f   :  { %914 = vmatpush1.bf16.msra.mxu0 %v1610_v63 }
  0x90   :  { %915 = vmatprep.subr.bf16.mxu0 %v1616_v3 }
  0x93   :  { %916 = vmatpush1.bf16.msra.mxu0 %v1614_v5 }
  0x94   :  { %917 = vmatprep.subr.bf16.mxu0 %v1620_v8 }
  0x97   :  { %918 = vmatpush1.bf16.msra.mxu0 %v1618_v9 }
  0xa3   :  { %v565_v54 = vpop.trf.xlu0 }
  0xc6   :  { %v545_v22 = vpop.permute.xlu0 %544 }
  0xc7   :  { %v550_v17 = vpop.permute.xlu1 %549 }
  0xcb   :  { %v620_v23 = vpop.permute.xlu1 %619 }
  0xcf   :  { %v625_v33 = vpop.permute.xlu1 %624 }
 0x120   :  { %v427_v46 = vpop.f32.mrf.mxu1 }
 0x122   :  { %v429_v47 = vpop.f32.mrf.mxu1  ;;  %v1931_v52 = vpop.f32.mrf.mxu0 }
 0x124   :  { %v431_v48 = vpop.f32.mrf.mxu1  ;;  %v1432_v53 = vpop.f32.mrf.mxu0 }
 0x125   :  { %v477_v49 = vpack.c.bf16 %v431_v48, %v427_v46  ;;  %v1632_v46 = vld [vmem:[#allocation5 + $0x68] ss:$12 sps:$4 sm:$0xff]   ;;  %v1634_v48 = vld [vmem:[#allocation5 + $0x38] ss:$12 sps:$4 sm:$0xff]  }
 0x126   :  { %v433_v50 = vpop.f32.mrf.mxu1  ;;  %v1934_v56 = vpop.f32.mrf.mxu0  ;;  %v1639_v53 = vld [vmem:[#allocation10 + $0x30] sm:$0xff]  }
 0x127   :  { %1455 = vmatpush3.bf16.msra.mxu1 %v477_v49  ;;  %v478_v51 = vpack.c.bf16 %v433_v50, %v429_v47  ;;  %v1633_v47 = vld [vmem:[#allocation5 + $0x50] ss:$12 sps:$4 sm:$0xff]   ;;  %v1635_v49 = vld [vmem:[#allocation5 + $0x20] ss:$12 sps:$4 sm:$0xff]   ;;  %v1636_v50 = vld [vmem:[#allocation5 + $0x8] ss:$12 sps:$4 sm:$0xff]  }
 0x128   :  { %1460 = vmatprep.subr.bf16.mxu1 %v1784_v1  ;;  %v1433_v57 = vpop.f32.mrf.mxu0 }
 0x12a   :  { %1457 = vmatmul.mubr.msk.bf16.vlgmr.msra.gmra.mxu1 %vm497_vm1, %v1886_v11  ;;  %v1624_v11 = vld [vmem:[#allocation5 + $0x1c] ss:$12 sps:$4 sm:$0xff]  }
 0x12b   :  { %1461 = vmatpush3.bf16.msra.mxu1 %v478_v51  ;;  %1462 = vmatprep.mubr.msk.bf16.mxu1 %vm1785_vm0, %v1784_v1  ;;  %v1638_v51 = vld [vmem:[#allocation10 + $0x38] sm:$0xff]  }
 0x12c   :  { %1466 = vmatprep.subr.bf16.mxu1 %v1784_v1  ;;  %919 = vmatprep.subr.bf16.mxu0 %v1624_v11  ;;  %v1641_v11 = vld [vmem:[#allocation10 + $0x20] sm:$0xff]  }
 0x12d   :  { %920 = vmatpush1.bf16.msra.mxu0 %v1622_v12  ;;  %v1642_v12 = vld [vmem:[#allocation10 + $0x18] sm:$0xff]  }
 0x12e   :  { %921 = vmatprep.subr.bf16.mxu0 %v1628_v14  ;;  %v1644_v14 = vld [vmem:[#allocation10 + $0x8] sm:$0xff]  }
 0x131   :  { %922 = vmatpush1.bf16.msra.mxu0 %v1626_v15  ;;  %v1645_v15 = vld [vmem:[#allocation10] sm:$0xff]  }
 0x132   :  { %1463 = vmatmul.mubr.msk.bf16.vlgmr.msra.gmra.mxu1 %vm497_vm1, %v565_v54  ;;  %1518 = vmatprep.subr.bf16.mxu0 %v1784_v1  ;;  %v1640_v54 = vld [vmem:[#allocation10 + $0x28] sm:$0xff]  }
 0x133   :  { %1467 = vmatpush3.bf16.msra.mxu1 %v1597_v55  ;;  %1482 = vmatprep.mubr.msk.bf16.mxu1 %vm1785_vm0, %v1784_v1  ;;  %v1279_v55 = vld [vmem:[%s2012_s11] ss:$0 sm:$0xff] }
 0x134   :  { %1468 = vmatprep.subr.bf16.mxu1 %v1784_v1  ;;  %v225_v57 = vadd.f32 %v1279_v55, %v1931_v52  ;;  %v228_v63 = vadd.f32 %v1279_v55, %v1934_v56  ;;  %v1078_v52 = vpop.trf.xlu1 }
 0x137   :  { %1469 = vmatpush3.bf16.msra.mxu1 %v1601_v58 }
 0x138   :  { %1470 = vmatprep.subr.bf16.mxu1 %v1784_v1 }
 0x13b   :  { %1471 = vmatpush3.bf16.msra.mxu1 %v1605_v59 }
 0x13c   :  { %1472 = vmatprep.subr.bf16.mxu1 %v1784_v1 }
 0x13f   :  { %1473 = vmatpush3.bf16.msra.mxu1 %v1609_v60 }
 0x140   :  { %1474 = vmatprep.subr.bf16.mxu1 %v1784_v1 }
 0x142   :  { %v470_v62 = vpop.f32.mrf.mxu0 }
 0x143   :  { %1475 = vmatpush3.bf16.msra.mxu1 %v1613_v2  ;;  %v486_v25 = vadd.f32 %v1313_v20, %v470_v62 }
 0x144   :  { %v1452_v0 = vpop.f32.mrf.mxu0  ;;  %1476 = vmatprep.subr.bf16.mxu1 %v1784_v1 }
 0x146   :  { %v473_v4 = vpop.f32.mrf.mxu0 }
 0x147   :  { %1477 = vmatpush3.bf16.msra.mxu1 %v1617_v7  ;;  %v487_v28 = vadd.f32 %v1313_v20, %v473_v4 }
 0x148   :  { %v1453_v6 = vpop.f32.mrf.mxu0  ;;  %1478 = vmatprep.subr.bf16.mxu1 %v1784_v1 }
 0x14b   :  { %1479 = vmatpush3.bf16.msra.mxu1 %v1621_v10 }
 0x14c   :  { %1480 = vmatprep.subr.bf16.mxu1 %v1784_v1 }
 0x14f   :  { %1481 = vmatpush3.bf16.msra.mxu1 %v1625_v13  ;;  %v1643_v13 = vld [vmem:[#allocation10 + $0x10] sm:$0xff]  }
 0x150   :  { %1486 = vmatprep.subr.bf16.mxu1 %v1784_v1 }
 0x1ea   :  { %v535_v18 = vpop.f32.mrf.mxu1 }
 0x1eb   :  { %v552_v26 = vmul.f32 %v545_v22, %v535_v18  ;;  %v1349_v22 = vld [vmem:[%s2008_s7] ss:$0 sm:$0xff]  ;;  %s1786_s7 = smov [#allocation11]  }
 0x1ec   :  { %v1458_v19 = vpop.f32.mrf.mxu1  ;;  %s1265_s22 = sshll.u32 %s1786_s7, 4  ;;  %s1266_s22 = int_to_ptr.vmem [resolvable:$true] %s1265_s22 }
 0x1ed   :  { %v629_v32 = vadd.f32 %v552_v26, %v486_v25  ;;  %s1746_s23 = scalar_lea.vmem %s1266_s22, 256  ;;  %p1751_p12 = scmp.lt.s32.totalorder %s1266_s22, %s1266_s22 }
 0x1ee   :  { %v538_v21 = vpop.f32.mrf.mxu1  ;;  %p1747_p11 = scmp.ne.s32.totalorder %s1266_s22, %s1746_s23  ;;  %p1752_p13 = scmp.lt.s32.totalorder %s1746_s23, %s1746_s23 }
 0x1ef   :  { %v553_v29 = vmul.f32 %v550_v17, %v538_v21 }
 0x1f0   :  { %v1459_v24 = vpop.f32.mrf.mxu1  ;;  %p1753_p0 = por %p1752_p13, %p1751_p12 }
 0x1f1   :  { %v630_v35 = vadd.f32 %v553_v29, %v487_v28 }
 0x1f2   :  { %v610_v27 = vpop.f32.mrf.mxu1  ;;  %p1754_p1 = pnand %p1753_p0, %p1747_p11 }
 0x1f3   :  { %v627_v30 = vmul.f32 %v620_v23, %v610_v27 }
 0x1f4   :  { %v1464_v31 = vpop.f32.mrf.mxu1 }
 0x1f5   :  { %v631_v36 = vadd.f32 %v629_v32, %v627_v30 }
 0x1f6   :  { %v613_v34 = vpop.f32.mrf.mxu1 }
 0x1f7   :  { %v628_v37 = vmul.f32 %v625_v33, %v613_v34  ;;  %v633_v40 = vmax.f32 %v631_v36, 0.0 }
 0x1f8   :  { %v1465_v38 = vpop.f32.mrf.mxu1 }
 0x1f9   :  { %v632_v39 = vadd.f32 %v630_v35, %v628_v37 }
 0x1fb   :  { %v634_v41 = vmax.f32 %v632_v39, 0.0 }
 0x1fd   :  { %v635_v43 = vpack.c.bf16 %v634_v41, %v633_v40 }
 0x1ff   :  { %1483 = vmatmul.mubr.bf16.vlgmr.msra.gmra.mxu1 %v635_v43  ;;  %940 = vmatmul.mubr.bf16.vlgmr.msra.gmra.mxu0 %v635_v43 }
 0x200   :  { %1487 = vmatpush3.bf16.msra.mxu1 %v1629_v42  ;;  %1502 = vmatprep.mubr.msk.bf16.mxu1 %vm1785_vm0, %v1784_v1 }
 0x201   :  { %1488 = vmatprep.subr.bf16.mxu1 %v1784_v1  ;;  %1534 = vmatprep.mubr.msk.bf16.mxu0 %vm1785_vm0, %v1784_v1 }
 0x202   :  { %1519 = vmatpush3.bf16.msra.mxu0 %v1638_v51 }
 0x203   :  { %1520 = vmatprep.subr.bf16.mxu0 %v1784_v1 }
 0x204   :  { %1489 = vmatpush3.bf16.msra.mxu1 %v1630_v44 }
 0x205   :  { %1490 = vmatprep.subr.bf16.mxu1 %v1784_v1 }
 0x206   :  { %1521 = vmatpush3.bf16.msra.mxu0 %v1639_v53 }
 0x207   :  { %1522 = vmatprep.subr.bf16.mxu0 %v1784_v1 }
 0x208   :  { %1491 = vmatpush3.bf16.msra.mxu1 %v1631_v45 }
 0x209   :  { %1492 = vmatprep.subr.bf16.mxu1 %v1784_v1 }
 0x20a   :  { %1523 = vmatpush3.bf16.msra.mxu0 %v1640_v54 }
 0x20b   :  { %1524 = vmatprep.subr.bf16.mxu0 %v1784_v1 }
 0x20c   :  { %1493 = vmatpush3.bf16.msra.mxu1 %v1632_v46 }
 0x20d   :  { %1494 = vmatprep.subr.bf16.mxu1 %v1784_v1 }
 0x20e   :  { %1525 = vmatpush3.bf16.msra.mxu0 %v1641_v11 }
 0x20f   :  { %1526 = vmatprep.subr.bf16.mxu0 %v1784_v1 }
 0x210   :  { %1495 = vmatpush3.bf16.msra.mxu1 %v1633_v47 }
 0x211   :  { %1496 = vmatprep.subr.bf16.mxu1 %v1784_v1 }
 0x212   :  { %1527 = vmatpush3.bf16.msra.mxu0 %v1642_v12 }
 0x213   :  { %1528 = vmatprep.subr.bf16.mxu0 %v1784_v1 }
 0x214   :  { %1497 = vmatpush3.bf16.msra.mxu1 %v1634_v48 }
 0x215   :  { %1498 = vmatprep.subr.bf16.mxu1 %v1784_v1 }
 0x216   :  { %1529 = vmatpush3.bf16.msra.mxu0 %v1643_v13 }
 0x217   :  { %1530 = vmatprep.subr.bf16.mxu0 %v1784_v1 }
 0x218   :  { %1499 = vmatpush3.bf16.msra.mxu1 %v1635_v49 }
 0x219   :  { %1500 = vmatprep.subr.bf16.mxu1 %v1784_v1 }
 0x21a   :  { %1531 = vmatpush3.bf16.msra.mxu0 %v1644_v14 }
 0x21b   :  { %1532 = vmatprep.subr.bf16.mxu0 %v1784_v1 }
 0x21c   :  { %1501 = vmatpush3.bf16.msra.mxu1 %v1636_v50 }
 0x21d   :  { %1506 = vmatprep.subr.bf16.mxu1 %v1784_v1 }
 0x21e   :  { %1533 = vmatpush3.bf16.msra.mxu0 %v1645_v15 }
 0x21f   :  { %1503 = vmatmul.mubr.bf16.vlgmr.msra.gmra.mxu1 %v635_v43 }
 0x220   :  { %1508 = vmatprep.mubr.msk.bf16.mxu1 %vm1785_vm0, %v1784_v1 }
 0x2bf   :  { %v736_v58 = vpop.f32.mrf.mxu1  ;;  %v941_v59 = vpop.f32.mrf.mxu0 }
 0x2c0   :  { %v1978_v60 = vadd.f32 %v736_v58, %v225_v57 }
 0x2c1   :  { %v1484_v61 = vpop.f32.mrf.mxu1  ;;  %v943_v62 = vpop.f32.mrf.mxu0 }
 0x2c3   :  { %v739_v0 = vpop.f32.mrf.mxu1  ;;  %v945_v2 = vpop.f32.mrf.mxu0 }
 0x2c4   :  { %v1981_v3 = vadd.f32 %v739_v0, %v228_v63  ;;  %v991_v4 = vpack.c.bf16 %v945_v2, %v941_v59 }
 0x2c5   :  { %v1485_v5 = vpop.f32.mrf.mxu1  ;;  %v947_v6 = vpop.f32.mrf.mxu0 }
 0x2c6   :  { %1507 = vmatpush3.bf16.msra.mxu1 %v991_v4  ;;  %v992_v7 = vpack.c.bf16 %v947_v6, %v943_v62 }
 0x2c7   :  { %1512 = vmatprep.subr.bf16.mxu1 %v1784_v1 }
 0x2c9   :  { %1509 = vmatmul.mubr.msk.bf16.vlgmr.msra.gmra.mxu1 %vm497_vm1, %v1951_v16  ;;  %v1058_v16 = vpop.permute.xlu0 %1057 }
 0x2ca   :  { %1513 = vmatpush3.bf16.msra.mxu1 %v992_v7  ;;  %1514 = vmatprep.mubr.msk.bf16.mxu1 %vm1785_vm0, %v1784_v1 }
 0x2cd   :  { %v1063_v17 = vpop.permute.xlu0 %1062 }
 0x2d1   :  { %1515 = vmatmul.mubr.msk.bf16.vlgmr.msra.gmra.mxu1 %vm497_vm1, %v1078_v52  ;;  %v1133_v21 = vpop.permute.xlu0 %1132 }
 0x2d5   :  { %v1138_v31 = vpop.permute.xlu0 %1137 }
 0x2df   :  { %v984_v56 = vpop.f32.mrf.mxu1 }
 0x2e0   :  { %v1000_v26 = vadd.f32 %v1349_v22, %v984_v56 }
 0x2e1   :  { %v1504_v8 = vpop.f32.mrf.mxu1 }
 0x2e3   :  { %v987_v9 = vpop.f32.mrf.mxu1 }
 0x2e4   :  { %v1001_v1 = vadd.f32 %v1349_v22, %v987_v9 }
 0x2e5   :  { %v1505_v10 = vpop.f32.mrf.mxu1 }
 0x389   :  { %v1048_v18 = vpop.f32.mrf.mxu1 }
 0x38a   :  { %v1065_v24 = vmul.f32 %v1058_v16, %v1048_v18 }
 0x38b   :  { %v1510_v19 = vpop.f32.mrf.mxu1 }
 0x38c   :  { %v1142_v30 = vadd.f32 %v1065_v24, %v1000_v26 }
 0x38d   :  { %v1051_v20 = vpop.f32.mrf.mxu1 }
 0x38e   :  { %v1066_v27 = vmul.f32 %v1063_v17, %v1051_v20 }
 0x38f   :  { %v1511_v23 = vpop.f32.mrf.mxu1 }
 0x390   :  { %v1143_v33 = vadd.f32 %v1066_v27, %v1001_v1 }
 0x391   :  { %v1123_v25 = vpop.f32.mrf.mxu1 }
 0x392   :  { %v1140_v28 = vmul.f32 %v1133_v21, %v1123_v25 }
 0x393   :  { %v1516_v29 = vpop.f32.mrf.mxu1 }
 0x394   :  { %v1144_v34 = vadd.f32 %v1142_v30, %v1140_v28 }
 0x395   :  { %v1126_v32 = vpop.f32.mrf.mxu1 }
 0x396   :  { %v1141_v35 = vmul.f32 %v1138_v31, %v1126_v32  ;;  %v1146_v38 = vmax.f32 %v1144_v34, 0.0 }
 0x397   :  { %v1517_v36 = vpop.f32.mrf.mxu1 }
 0x398   :  { %v1145_v37 = vadd.f32 %v1143_v33, %v1141_v35 }
 0x39a   :  { %v1147_v39 = vmax.f32 %v1145_v37, 0.0 }
 0x39c   :  { %v1148_v40 = vpack.c.bf16 %v1147_v39, %v1146_v38 }
 0x39e   :  { %1535 = vmatmul.mubr.bf16.vlgmr.msra.gmra.mxu0 %v1148_v40 }
 0x45e   :  { %v1249_v41 = vpop.f32.mrf.mxu0 }
 0x45f   :  { %v1256_v42 = vadd.f32 %v1249_v41, %v1978_v60 }
 0x460   :  { %v1536_v43 = vpop.f32.mrf.mxu0 }
 0x461   :  { %1258 = vst [vmem:[#allocation11] sm:$0xff] %v1256_v42 }
 0x462   :  { %v1252_v44 = vpop.f32.mrf.mxu0 }
 0x463   :  { %v1257_v45 = vadd.f32 %v1252_v44, %v1981_v3 }
 0x464   :  { %v1537_v46 = vpop.f32.mrf.mxu0 }
 0x465   :  { %1259 = vst [vmem:[#allocation11 + $0x8] sm:$0xff] %v1257_v45 }
 0x466   :  { %1757 = shalt.err (!%p1754_p1)
}
 0x467   :  { %s1787_s26 = smov 128   ;;  %s1788_s27 = smov 8  }
 0x468   :  { %1271 = dma.vmem_to_hbm [thread:$0]  %s1266_s22, 256, %s2013_s12, [#allocation4], %s1787_s26, %s1787_s26, %s1788_s27  }
 0x469   :  { %1772 = dma.done.wait [#allocation4], 256  }
 0x46a   :  { %1773 = vsyncadd [#allocation4], 4294967040 }
 0x46b   :  { %1275 = vsyncpa [#allocation3], 1 }
 0x46c   :  { %1276 = vsyncpa [#allocation6], 1 }
 0x46d   :  { %1277 = vsyncpa [#allocation9], 1 }
 0x46e   :  { %1278 = vsyncpa [#allocation4], 1 }

</bundles_post_ra>
